<compile_context>
chip_gen: v7x
topology: tpu7x:2x2x1
jax: 0.10.0
libtpu: 0.0.40
codegen_flags: <defaults>
</compile_context>

<pallas_src>
import functools

import jax
import jax.numpy as jnp
import numpy as np
from jax.experimental import pallas as pl
from jax.experimental.pallas import tpu as pltpu

# ----------------------------- configuration --------------------------------
B = 2              # batch
HIN = WIN = 32     # input spatial size (PyTorch NCHW input: (B, 3, 32, 32))
CIN = 3            # input channels
CBB = 16           # backbone output channels
C = 16             # reduced channels fed to RESA
HO = WO = 16       # feature-map spatial size after the stride-2 backbone
HW = HO * WO       # 256  -> lane axis of every in-kernel feature map
HWIN = HIN * WIN   # 1024 -> lane axis of the upsampled segmentation map
ITERS = 2          # RESA iterations
KSIZE = 5          # RESA 1-D conv kernel size
ALPHA = 2.0        # RESA update coefficient
NUM_CLASSES = 5    # segmentation classes (decoder output channels)
NUM_LANES = 4      # lane-existence outputs
HIDDEN = 32        # lane classifier hidden width

# space-to-depth block offsets of the stride-2 3x3 backbone conv (4 taps)
_BB_TAPS = ((-1, -1), (-1, 0), (0, -1), (0, 0))


def _build_s2d_selection():
    """(4, 4*CIN, 9*CIN) 0/1 matrix mapping im2col weights -> s2d tap weights."""
    sel = np.zeros((4, 4 * CIN, 9 * CIN), np.float32)
    for t, (bh, bw) in enumerate(_BB_TAPS):
        for rh in range(2):
            for rw in range(2):
                kh = 2 * bh + rh + 1
                kw = 2 * bw + rw + 1
                if 0 <= kh < 3 and 0 <= kw < 3:
                    for ci in range(CIN):
                        sel[t, (rh * 2 + rw) * CIN + ci,
                            (kh * 3 + kw) * CIN + ci] = 1.0
    return sel


_S2D_SEL = _build_s2d_selection()


# -------------------- pltpu.roll direction self-check ------------------------
def _roll_probe_kernel(x_ref, o_ref):
    o_ref[...] = pltpu.roll(x_ref[...], 1, 1)


def detect_roll_sign():
    """Probe pltpu.roll's rotation convention; the sign is baked into the kernel."""
    x = jax.lax.broadcasted_iota(jnp.float32, (8, 256), 1)
    y = pl.pallas_call(
        _roll_probe_kernel,
        out_shape=jax.ShapeDtypeStruct((8, 256), jnp.float32),
    )(x)
    v = int(jax.device_get(y[0, 0]))
    if v == 255:
        return -1   # pltpu.roll matches jnp.roll: y[p] = x[(p - shift) % L]
    if v == 1:
        return +1   # opposite convention:        y[p] = x[(p + shift) % L]
    raise RuntimeError(f"unexpected pltpu.roll semantics (probe value {v})")


def _gather_lanes(x, s, roll_sign):
    """y[..., p] = x[..., (p + s) % L]  (circular gather along the lane axis)."""
    length = x.shape[-1]
    amt = (roll_sign * s) % length
    if amt == 0:
        return x
    return pltpu.roll(x, amt, x.ndim - 1)


# ------------------------ the single fused TPU kernel ------------------------
def _resa_net_kernel(x_ref, wbb_ref, bbb_ref, wred_ref, bred_ref, wresa_ref,
                     wdec_ref, bdec_ref, u_ref, wlane_ref, blane_ref,
                     w1e_ref, b1_ref, wl2_ref, b2_ref,
                     seg_ref, lane_ref, *, roll_sign):
    f32 = jnp.float32

    # ------------- backbone: 3x3 stride-2 conv + bias + ReLU -----------------
    # input is space-to-depth: (4*CIN, HO*WO); the stride-2 conv becomes a 2x2
    # conv over the block grid = 4 lane-shifted, masked taps.
    x12 = x_ref[0].astype(f32)                                       # (12, 256)
    pos12 = jax.lax.broadcasted_iota(jnp.int32, (4 * CIN, HW), 1)
    ph12, pw12 = pos12 // WO, pos12 % WO
    acc = jnp.zeros((CBB, HW), f32) + bbb_ref[...]                   # (16, 256)
    for t, (bh, bw) in enumerate(_BB_TAPS):
        shifted = _gather_lanes(x12, bh * WO + bw, roll_sign)
        valid = jnp.logical_and(ph12 + bh >= 0, pw12 + bw >= 0)
        shifted = jnp.where(valid, shifted, 0.0)
        acc = acc + jnp.dot(wbb_ref[t], shifted, preferred_element_type=f32)
    feat = jnp.maximum(acc, 0.0)                                      # (CBB, HW)

    # ---------- channel reducer: 1x1 conv + folded eval-mode BN + ReLU -------
    feat = jnp.dot(wred_ref[...], feat, preferred_element_type=f32) + bred_ref[...]
    feat = jnp.maximum(feat, 0.0)                                     # (C, HW)

    # ------------------------ RESA message passing ---------------------------
    posc = jax.lax.broadcasted_iota(jnp.int32, (C, HW), 1)
    hh, ww = posc // WO, posc % WO
    half = KSIZE // 2
    xr = feat
    for d in range(4):                      # 0='d', 1='u', 2='r', 3='l'
        vertical = d < 2
        dim = HO if vertical else WO
        for i in range(ITERS):
            s = dim // (2 ** (ITERS - i))
            g = s if d in (0, 2) else (dim - s) % dim
            if vertical:                    # circular shift along H
                x_sh = _gather_lanes(xr, g * WO, roll_sign)
            else:                           # circular shift along W (per row)
                wrap_a = _gather_lanes(xr, g, roll_sign)
                wrap_b = _gather_lanes(xr, g - WO, roll_sign)
                x_sh = jnp.where(ww + g < WO, wrap_a, wrap_b)
            # 5 zero-padded 1-D conv taps -> one K = KSIZE*C contraction
            taps = []
            for k in range(KSIZE):
                off = k - half
                if vertical:                # conv along W
                    tk = _gather_lanes(x_sh, off, roll_sign)
                    m = jnp.logical_and(ww + off >= 0, ww + off < WO)
                else:                       # conv along H
                    tk = _gather_lanes(x_sh, off * WO, roll_sign)
                    m = jnp.logical_and(hh + off >= 0, hh + off < HO)
                taps.append(jnp.where(m, tk, 0.0))
            xcat = jnp.concatenate(taps, axis=0)                      # (80, 256)
            y = jnp.dot(wresa_ref[d * ITERS + i], xcat,
                        preferred_element_type=f32)                   # (C, 256)
            xr = xr + ALPHA * jnp.maximum(y, 0.0)

    # ------- decoder: 1x1 conv + bilinear upsample folded into one matmul ----
    logits = jnp.dot(wdec_ref[...], xr, preferred_element_type=f32) + bdec_ref[...]
    seg = jnp.dot(logits.astype(jnp.bfloat16), u_ref[...],
                  preferred_element_type=f32)                         # (5, 1024)
    seg_ref[0] = seg.astype(seg_ref.dtype)

    # ------- lane head: 1x1 conv + class softmax + (avgpool+linear folded) ---
    # TODO(synk): the original EDLaneExist head uses a dilated 3x3 conv + BN;
    # represented here by a 1x1 conv head with the same softmax/pool/linear tail.
    z = jnp.dot(wlane_ref[...], xr, preferred_element_type=f32) + blane_ref[...]
    zmax = z[0:1, :]
    for cls in range(1, NUM_CLASSES):
        zmax = jnp.maximum(zmax, z[cls:cls + 1, :])
    e = jnp.exp(z - zmax)                                             # (5, 256)
    esum = e[0:1, :]
    for cls in range(1, NUM_CLASSES):
        esum = esum + e[cls:cls + 1, :]
    prob = e * pl.reciprocal(esum, approx=True)
    hdn = jnp.zeros((1, HIDDEN), f32) + b1_ref[...]
    for cls in range(NUM_CLASSES):          # avgpool folded into w1e
        hdn = hdn + jnp.dot(prob[cls:cls + 1, :], w1e_ref[cls],
                            preferred_element_type=f32)
    hdn = jnp.maximum(hdn, 0.0)
    lane = jnp.dot(hdn, wl2_ref[...], preferred_element_type=f32) + b2_ref[...]
    lane_ref[0] = lane.astype(lane_ref.dtype)


def _full_spec(shape):
    ndim = len(shape)
    return pl.BlockSpec(shape, lambda b: (0,) * ndim)


def _interp_matrix(n_in, n_out):
    # bilinear interpolation matrix, align_corners=True (matches F.interpolate)
    src = jnp.arange(n_out, dtype=jnp.float32) * (n_in - 1) / (n_out - 1)
    lo = jnp.floor(src).astype(jnp.int32)
    hi = jnp.minimum(lo + 1, n_in - 1)
    frac = src - lo.astype(jnp.float32)
    m = jnp.zeros((n_out, n_in), jnp.float32)
    m = m.at[jnp.arange(n_out), lo].add(1.0 - frac)
    m = m.at[jnp.arange(n_out), hi].add(frac)
    return m


# ------------------------------- forward pass --------------------------------
@functools.partial(jax.jit, static_argnames=("roll_sign",))
def resa_net_forward(x_nchw, params, *, roll_sign):
    Bn = x_nchw.shape[0]
    x = x_nchw.astype(jnp.float32)

    # space-to-depth rearrangement of the input: (B, 4*CIN, HO*WO)
    x_s2d = (x.reshape(Bn, CIN, HO, 2, WO, 2)
              .transpose(0, 3, 5, 1, 2, 4)
              .reshape(Bn, 4 * CIN, HW))

    # backbone weights -> per-tap (CBB, 4*CIN) matrices
    w_bb_taps = jnp.einsum("tpr,rc->tcp", jnp.asarray(_S2D_SEL), params["w_bb"],
                           precision="highest")                      # (4,16,12)
    b_bb = params["b_bb"].reshape(CBB, 1)

    # channel reducer with eval-mode BatchNorm folded in
    scale = params["bn_gamma"] * jax.lax.rsqrt(params["bn_var"] + 1e-5)
    w_red_t = (params["w_red"] * scale[None, :]).T                   # (C, CBB)
    b_red = (params["bn_beta"] - params["bn_mean"] * scale).reshape(C, 1)

    # RESA weights -> (4*ITERS, C_out, KSIZE*C_in)
    w_resa2 = params["w_resa"].transpose(0, 3, 1, 2).reshape(4 * ITERS, C, KSIZE * C)

    # decoder 1x1 conv + combined bilinear-upsample matrix (align_corners=True)
    w_dec_t = params["w_dec"].T                                      # (5, C)
    b_dec = params["b_dec"].reshape(NUM_CLASSES, 1)
    mh = _interp_matrix(HO, HIN)
    mw = _interp_matrix(WO, WIN)
    u = jnp.einsum("oh,pw->hwop", mh, mw).reshape(HW, HWIN)          # (256,1024)
    u = u.astype(jnp.bfloat16)                                       # bf16 MXU operands

    # lane head: 1x1 conv, then avgpool folded into the first linear layer
    w_lane_t = params["w_lane"].T                                    # (5, C)
    b_lane = params["b_lane"].reshape(NUM_CLASSES, 1)
    w1 = params["w_l1"].reshape(NUM_CLASSES, HO // 2, WO // 2, HIDDEN)
    w1e = (jnp.repeat(jnp.repeat(w1, 2, axis=1), 2, axis=2) * 0.25
           ).reshape(NUM_CLASSES, HW, HIDDEN)                        # (5,256,32)
    b_l1 = params["b_l1"].reshape(1, HIDDEN)
    w_l2 = params["w_l2"]
    b_l2 = params["b_l2"].reshape(1, NUM_LANES)

    kern = functools.partial(_resa_net_kernel, roll_sign=roll_sign)
    out_seg, lane = pl.pallas_call(
        kern,
        out_shape=(jax.ShapeDtypeStruct((Bn, NUM_CLASSES, HWIN), jnp.float32),
                   jax.ShapeDtypeStruct((Bn, 1, NUM_LANES), jnp.float32)),
        grid=(Bn,),
        in_specs=[
            pl.BlockSpec((1, 4 * CIN, HW), lambda b: (b, 0, 0)),
            _full_spec(w_bb_taps.shape), _full_spec(b_bb.shape),
            _full_spec(w_red_t.shape), _full_spec(b_red.shape),
            _full_spec(w_resa2.shape),
            _full_spec(w_dec_t.shape), _full_spec(b_dec.shape), _full_spec(u.shape),
            _full_spec(w_lane_t.shape), _full_spec(b_lane.shape),
            _full_spec(w1e.shape), _full_spec(b_l1.shape),
            _full_spec(w_l2.shape), _full_spec(b_l2.shape),
        ],
        out_specs=(pl.BlockSpec((1, NUM_CLASSES, HWIN), lambda b: (b, 0, 0)),
                   pl.BlockSpec((1, 1, NUM_LANES), lambda b: (b, 0, 0))),
        compiler_params=pltpu.CompilerParams(dimension_semantics=("parallel",)),
    )(x_s2d, w_bb_taps, b_bb, w_red_t, b_red, w_resa2, w_dec_t, b_dec, u,
      w_lane_t, b_lane, w1e, b_l1, w_l2, b_l2)

    return {"out": out_seg.reshape(Bn, NUM_CLASSES, HIN, WIN),
            "lane": lane.reshape(Bn, NUM_LANES)}


# ------------------- independent pure-JAX reference (f32) --------------------
def reference_forward(x_nchw, params):
    Bn = x_nchw.shape[0]
    x = jnp.transpose(x_nchw, (0, 2, 3, 1)).astype(jnp.float32)      # (B,32,32,3)

    # backbone: im2col + matmul
    xp = jnp.pad(x, ((0, 0), (1, 1), (1, 1), (0, 0)))
    cols = [xp[:, di:di + 2 * HO - 1:2, dj:dj + 2 * WO - 1:2, :]
            for di in range(3) for dj in range(3)]
    patches = jnp.concatenate(cols, axis=-1).reshape(Bn * HO * WO, 9 * CIN)
    feat = jnp.maximum(
        jnp.dot(patches, params["w_bb"], precision="highest") + params["b_bb"], 0.0)

    # channel reducer: 1x1 conv, then eval-mode BN, then ReLU
    y = jnp.dot(feat, params["w_red"], precision="highest")
    y = ((y - params["bn_mean"]) * jax.lax.rsqrt(params["bn_var"] + 1e-5)
         * params["bn_gamma"] + params["bn_beta"])
    feat = jnp.maximum(y, 0.0).reshape(Bn, HO, WO, C)

    # RESA (circular directional shift + zero-padded 1-D conv)
    def resa_one(xhwc):
        xx = xhwc
        half = KSIZE // 2
        for d in range(4):
            vertical = d < 2
            dim = HO if vertical else WO
            for i in range(ITERS):
                s = dim // (2 ** (ITERS - i))
                g = s if d in (0, 2) else (dim - s) % dim
                xsh = jnp.roll(xx, -g, axis=0 if vertical else 1)
                if vertical:
                    xpd = jnp.pad(xsh, ((0, 0), (half, half), (0, 0)))
                else:
                    xpd = jnp.pad(xsh, ((half, half), (0, 0), (0, 0)))
                yy = jnp.zeros_like(xx)
                for k in range(KSIZE):
                    t = xpd[:, k:k + WO, :] if vertical else xpd[k:k + HO, :, :]
                    yy = yy + jnp.einsum("hwc,cd->hwd", t,
                                         params["w_resa"][d * ITERS + i, k],
                                         precision="highest")
                xx = xx + ALPHA * jnp.maximum(yy, 0.0)
        return xx

    feat = jax.vmap(resa_one)(feat)                                   # (B,16,16,C)

    # decoder: 1x1 conv + separable bilinear upsample (align_corners=True)
    logits = jnp.einsum("bhwc,cn->bhwn", feat, params["w_dec"],
                        precision="highest") + params["b_dec"]
    mh = _interp_matrix(HO, HIN)
    mw = _interp_matrix(WO, WIN)
    up = jnp.einsum("oh,bhwn->bown", mh, logits, precision="highest")
    up = jnp.einsum("pw,bown->bopn", mw, up, precision="highest")
    out_seg = jnp.transpose(up, (0, 3, 1, 2))

    # lane head: 1x1 conv + class softmax + 2x2 avgpool + MLP
    z = jnp.einsum("bhwc,cn->bhwn", feat, params["w_lane"],
                   precision="highest") + params["b_lane"]
    z = z - jnp.max(z, axis=-1, keepdims=True)
    e = jnp.exp(z)
    prob = e / jnp.sum(e, axis=-1, keepdims=True)                     # (B,16,16,5)
    prob = jnp.transpose(prob, (0, 3, 1, 2))
    pooled = prob.reshape(Bn, NUM_CLASSES, HO // 2, 2, WO // 2, 2).mean(axis=(3, 5))
    flat = pooled.reshape(Bn, -1)
    hdn = jnp.maximum(
        jnp.dot(flat, params["w_l1"], precision="highest") + params["b_l1"], 0.0)
    lane = jnp.dot(hdn, params["w_l2"], precision="highest") + params["b_l2"]
    return {"out": out_seg, "lane": lane}


# ---------------------------- deterministic params ----------------------------
def init_params(key):
    ks = jax.random.split(key, 12)

    def nrm(k, shape, scale):
        return scale * jax.random.normal(k, shape, jnp.float32)

    flat = NUM_CLASSES * (HO // 2) * (WO // 2)
    return {
        "w_bb":   nrm(ks[0], (9 * CIN, CBB), 0.2),
        "b_bb":   nrm(ks[1], (CBB,), 0.1),
        "w_red":  nrm(ks[2], (CBB, C), 0.2),
        "bn_gamma": 1.0 + 0.05 * jnp.arange(C, dtype=jnp.float32),
        "bn_beta":  0.01 * jnp.arange(C, dtype=jnp.float32),
        "bn_mean":  nrm(ks[3], (C,), 0.05),
        "bn_var":   1.0 + 0.1 * jnp.abs(jax.random.normal(ks[4], (C,), jnp.float32)),
        "w_resa": nrm(ks[5], (4 * ITERS, KSIZE, C, C), 0.05),
        "w_dec":  nrm(ks[6], (C, NUM_CLASSES), 0.2),
        "b_dec":  nrm(ks[7], (NUM_CLASSES,), 0.1),
        "w_lane": nrm(ks[8], (C, NUM_CLASSES), 0.2),
        "b_lane": nrm(ks[9], (NUM_CLASSES,), 0.1),
        "w_l1":   nrm(ks[10], (flat, HIDDEN), 0.1),
        "b_l1":   jnp.zeros((HIDDEN,), jnp.float32),
        "w_l2":   nrm(ks[11], (HIDDEN, NUM_LANES), 0.1),
        "b_l2":   jnp.zeros((NUM_LANES,), jnp.float32),
    }


if __name__ == "__main__":
    key = jax.random.PRNGKey(0)
    x = jax.random.normal(key, (B, CIN, HIN, WIN), jnp.float32)   # NCHW like PyTorch
    params = init_params(jax.random.PRNGKey(42))

    roll_sign = detect_roll_sign()   # resolve pltpu.roll's rotation convention

    res = resa_net_forward(x, params, roll_sign=roll_sign)
    res = jax.block_until_ready(res)

    assert res["out"].shape == (B, NUM_CLASSES, HIN, WIN), res["out"].shape
    assert res["lane"].shape == (B, NUM_LANES), res["lane"].shape
    assert bool(jnp.all(jnp.isfinite(res["out"])))
    assert bool(jnp.all(jnp.isfinite(res["lane"])))

    # validate against an independent pure-JAX reference of the same forward
    ref = jax.block_until_ready(jax.jit(reference_forward)(x, params))
    np.testing.assert_allclose(np.asarray(res["out"]), np.asarray(ref["out"]),
                               rtol=5e-2, atol=5e-2)
    np.testing.assert_allclose(np.asarray(res["lane"]), np.asarray(ref["lane"]),
                               rtol=5e-2, atol=5e-2)

    print("KERNEL_OK")
</pallas_src>

<mosaic_0001>
module attributes {stable_mosaic.version = 11 : i64} {
  func.func @_roll_probe_kernel(%arg0: memref<8x256xf32, #tpu.memory_space<vmem>>, %arg1: memref<8x256xf32, #tpu.memory_space<vmem>>) attributes {dimension_semantics = [], scalar_prefetch = 0 : i64, scratch_operands = 0 : i64, tpu.core_type = #tpu.core_type<tc>} {
    %c0 = arith.constant 0 : index
    %c0_0 = arith.constant 0 : index
    %0 = vector.load %arg0[%c0, %c0_0] : memref<8x256xf32, #tpu.memory_space<vmem>>, vector<8x256xf32>
    %c1_i32 = arith.constant 1 : i32
    %1 = tpu.dynamic_rotate %0 by %c1_i32 dim 1 : vector<8x256xf32>, i32 -> vector<8x256xf32>
    %c0_1 = arith.constant 0 : index
    %c0_2 = arith.constant 0 : index
    %2 = vector.load %arg1[%c0_1, %c0_2] : memref<8x256xf32, #tpu.memory_space<vmem>>, vector<8x256xf32>
    tpu.vector_store %arg1[%c0_1, %c0_2], %1 {strides = array<i32>} : memref<8x256xf32, #tpu.memory_space<vmem>>, vector<8x256xf32>,
    return
  }
}

</mosaic_0001>

<bundles_post_ra>
// kernel: tpu_custom_call.1
= control target key start
LH: loop header
LB: loop body
LE: loop exit
PB: predicated region body
PF: predicated region fallthrough
CT: control target
= control target key end

     0   :  { %6 = vsyncpa [#allocation3], 0  ;;  %s137_s0 = inlined_call_operand.hbm [shape: f32[8,256], index: 0, kind: input, shape index: {}]   ;;  %s138_s1 = inlined_call_operand.hbm [shape: f32[8,256], index: 1, kind: output, shape index: {}]  }
   0x1   :  { %7 = vsyncpa [#allocation4], 0  ;;  %s100_s6 = smov [#allocation2]   ;;  %s52_s10 = scalar_lea.hbm %s137_s0, 256 }
   0x2   :  { %s14_s7 = sshll.u32 %s100_s6, 4  ;;  %p53_p0 = scmp.ne.s32.totalorder %s137_s0, %s52_s10  ;;  %s15_s7 = int_to_ptr.vmem [resolvable:$true] %s14_s7 }
   0x3   :  { %p56_p1 = scmp.lt.u32.totalorder %s52_s10, %s137_s0 }
   0x5   :  { %p58_p2 = pnand %p56_p1, %p53_p0 }
   0x7   :  { %61 = shalt.err (!%p58_p2)
}
   0x8   :  { %s62_s15 = scalar_lea.vmem %s15_s7, 256  ;;  %p67_p4 = scmp.lt.s32.totalorder %s15_s7, %s15_s7 }
   0x9   :  { %p63_p3 = scmp.ne.s32.totalorder %s15_s7, %s62_s15  ;;  %p68_p5 = scmp.lt.s32.totalorder %s62_s15, %s62_s15 }
   0xb   :  { %p69_p6 = por %p68_p5, %p67_p4 }
   0xd   :  { %p70_p7 = pnand %p69_p6, %p63_p3 }
   0xf   :  { %73 = shalt.err (!%p70_p7)
}
  0x10   :  { %17 = dma.hbm_to_vmem [thread:$0]  %s137_s0, 256, %s15_s7, [#allocation3]  }
  0x11   :  { %96 = dma.done.wait [#allocation3], 256  }
  0x12   :  { %97 = vsyncadd [#allocation3], 4294967040  ;;  %v21_v0 = vld [vmem:[#allocation2] sm:$0xff]  ;;  %s101_s18 = smov 1   ;;  %v22_v1 = vld [vmem:[#allocation2 + $0x8] sm:$0xff]  ;;  %v27_v2 = vlaneseq  ;;  %s102_s19 = smov [#allocation5]  }
  0x13   :  { %23 = vrot.lane.b32.xlu0 %v21_v0, %s101_s18  ;;  %s40_s20 = sshll.u32 %s102_s19, 4  ;;  %s41_s20 = int_to_ptr.vmem [resolvable:$true] %s40_s20 }
  0x14   :  { %v28_v3 = vand.u32 127, %v27_v2  ;;  %s74_s0 = scalar_lea.vmem %s41_s20, 256  ;;  %p79_p9 = scmp.lt.s32.totalorder %s41_s20, %s41_s20 }
  0x15   :  { %p75_p8 = scmp.ne.s32.totalorder %s41_s20, %s74_s0  ;;  %p80_p10 = scmp.lt.s32.totalorder %s74_s0, %s74_s0 }
  0x16   :  { %vm29_vm0 = vcmp.lt.s32.totalorder %v28_v3, 1 }
  0x17   :  { %25 = vrot.lane.b32.xlu0 %v22_v1, %s101_s18  ;;  %p81_p11 = por %p80_p10, %p79_p9 }
  0x19   :  { %p82_p12 = pnand %p81_p11, %p75_p8 }
  0x85   :  { %v24_v4 = vpop.permute.xlu0 %23 }
  0x89   :  { %v26_v5 = vpop.permute.xlu0 %25 }
  0x8a   :  { %v30_v6 = vsel %vm29_vm0, %v24_v4, %v26_v5  ;;  %v31_v7 = vsel %vm29_vm0, %v26_v5, %v24_v4 }
  0x8b   :  { %32 = vst [vmem:[#allocation5] sm:$0xff] %v31_v7  ;;  %33 = vst [vmem:[#allocation5 + $0x8] sm:$0xff] %v30_v6 }
  0x8c   :  { %85 = shalt.err (!%p82_p12)
}
  0x8d   :  { %s86_s23 = scalar_lea.hbm %s138_s1, 256 }
  0x8e   :  { %p87_p13 = scmp.ne.s32.totalorder %s138_s1, %s86_s23  ;;  %p90_p0 = scmp.lt.u32.totalorder %s86_s23, %s138_s1 }
  0x90   :  { %p92_p1 = pnand %p90_p0, %p87_p13 }
  0x92   :  { %95 = shalt.err (!%p92_p1)
}
  0x93   :  { %43 = dma.vmem_to_hbm [thread:$0]  %s41_s20, 256, %s138_s1, [#allocation4]  }
  0x94   :  { %98 = dma.done.wait [#allocation4], 256  }
  0x95   :  { %99 = vsyncadd [#allocation4], 4294967040 }
  0x96   :  { %47 = vsyncpa [#allocation3], 1 }
  0x97   :  { %48 = vsyncpa [#allocation4], 1 }

</bundles_post_ra>
